<compile_context>
chip_gen: v7x
topology: tpu7x:2x2x1
jax: 0.10.0
libtpu: 0.0.40
codegen_flags: <defaults>
</compile_context>

<pallas_src>
import functools

import jax
import jax.numpy as jnp
from jax.experimental import pallas as pl
from jax.experimental.pallas import tpu as pltpu


# ----------------------------- Pallas kernel -----------------------------

def basic_block_kernel(x_ref, m_ref, w1_ref, b1_ref, w2_ref, b2_ref,
                       o_ref, h1_ref, *patch_scratch,
                       W, B, groups, im2col_1, im2col_2, compute_dtype):
    """Fused BasicBlock forward for one batch block (B images).

    x_ref : (Cin_p, B*HW)        input block, channels-major, flat spatial
    m_ref : (9, HW)              per-tap boundary masks (1 inside, 0 outside)
    w1_ref: (Cout_p, 9*Cin_p)    conv1 taps with bn1 scale folded in
    b1_ref: (Cout_p, 1)          bn1 shift (f32)
    w2_ref: (Cout_p, 9*Cout_p)   conv2 taps with bn2 scale folded in
    b2_ref: (Cout_p, 1)          bn2 shift (f32)
    o_ref : (Cout_p, B*HW)       output block
    h1_ref: (Cout_p, B*HW) f32   VMEM scratch staging the intermediate
    patch_scratch: optional (9*max(C_p), B*HW) VMEM scratch (im2col path)
    """
    HW = m_ref.shape[1]
    L = x_ref.shape[1]                       # B * HW
    cin_p = x_ref.shape[0]
    cout_p = o_ref.shape[0]
    patch_ref = patch_scratch[0] if patch_scratch else None

    masks = m_ref[...]                       # (9, HW) f32
    if B > 1:
        masks = jnp.concatenate([masks] * B, axis=1)   # (9, L)

    def conv3x3(z, w_ref, cp, use_im2col):
        """z: (cp, L) f32; returns (cout_p, L) f32 = W @ im2col(z)."""
        def tap(t, kh, kw):
            # Shifted tap via pltpu.roll (XLU); boundary zeroing via the mask
            # (VPU).  The mask also zeros every lane that would wrap into a
            # neighbouring image of the batch block, so the roll is safe.
            s = (kh - 1) * W + (kw - 1)
            shifted = z if s == 0 else pltpu.roll(z, shift=(-s) % L, axis=1)
            if t == 4:                       # centre tap: mask is all-ones
                return shifted
            return shifted * masks[t:t + 1, :]

        if use_im2col:
            # Small C: materialize (9*cp, L) patches once, one big MXU dot.
            for kh in range(3):
                for kw in range(3):
                    t = kh * 3 + kw
                    patch_ref[pl.ds(t * cp, cp), :] = (
                        tap(t, kh, kw).astype(compute_dtype))
            return jnp.dot(w_ref[...], patch_ref[pl.ds(0, 9 * cp), :],
                           preferred_element_type=jnp.float32)

        # Large C: per-tap accumulation, no patch buffer in VMEM.
        acc = None
        for kh in range(3):
            for kw in range(3):
                t = kh * 3 + kw
                part = jnp.dot(w_ref[:, t * cp:(t + 1) * cp],
                               tap(t, kh, kw).astype(compute_dtype),
                               preferred_element_type=jnp.float32)
                acc = part if acc is None else acc + part
        return acc

    x = x_ref[...]                           # (cin_p, L) f32

    # conv1 + bn1 + relu (bn1 scale folded in w1; shift added in f32 here).
    h1 = jnp.maximum(conv3x3(x, w1_ref, cin_p, im2col_1) + b1_ref[...], 0.0)
    h1_ref[...] = h1                         # stage intermediate in VMEM

    # conv2 + bn2.
    h2 = conv3x3(h1_ref[...], w2_ref, cout_p, im2col_2) + b2_ref[...]

    # out.index_add_(1, indices, identity): static channel groups -> exact
    # f32 VPU adds (duplicate indices accumulate, like index_add_).
    pieces = []
    o = 0
    while o < cout_p:
        srcs = groups[o]
        if srcs:
            r = x[srcs[0]:srcs[0] + 1, :]
            for c in srcs[1:]:
                r = r + x[c:c + 1, :]
            pieces.append(r)
            o += 1
        else:
            o2 = o
            while o2 < cout_p and not groups[o2]:
                o2 += 1
            pieces.append(jnp.zeros((o2 - o, L), jnp.float32))
            o = o2
    res = pieces[0] if len(pieces) == 1 else jnp.concatenate(pieces, axis=0)

    o_ref[...] = jnp.maximum(h2 + res, 0.0).astype(o_ref.dtype)


# ----------------------------- wrappers (glue) -----------------------------

def _round_up(n, m):
    return (n + m - 1) // m * m


def _tap_masks(H, W):
    """(9, H*W) f32 mask; mask[kh*3+kw, i*W+j] = 1 iff (i+kh-1, j+kw-1) in image."""
    i = jnp.arange(H)[:, None]
    j = jnp.arange(W)[None, :]
    masks = []
    for kh in range(3):
        dh = kh - 1
        for kw in range(3):
            dw = kw - 1
            m = ((i + dh >= 0) & (i + dh <= H - 1) &
                 (j + dw >= 0) & (j + dw <= W - 1))
            masks.append(m.reshape(H * W))
    return jnp.stack(masks, axis=0).astype(jnp.float32)


def prepare_params(w1_oihw, bn1, w2_oihw, bn2, indices, eps=1e-5,
                   compute_dtype=jnp.bfloat16):
    """Fold BN scales into (padded, compute-dtype) conv weights; build groups."""
    g1, b1, m1, v1 = bn1
    g2, b2, m2, v2 = bn2
    cout, cin = int(w1_oihw.shape[0]), int(w1_oihw.shape[1])
    cin_p, cout_p = _round_up(cin, 8), _round_up(cout, 8)

    s1 = g1 / jnp.sqrt(v1 + eps)
    s2 = g2 / jnp.sqrt(v2 + eps)

    def fold_pad(w_oihw, scale, ci, ci_p):
        co = int(w_oihw.shape[0])
        # OIHW -> (O, kh, kw, I); column (kh*3+kw)*ci_p + i matches the
        # tap-major / channel-minor row order produced in the kernel.
        w = jnp.transpose(w_oihw, (0, 2, 3, 1)) * scale[:, None, None, None]
        w = jnp.pad(w, ((0, cout_p - co), (0, 0), (0, 0), (0, ci_p - ci)))
        return w.reshape(cout_p, 9 * ci_p).astype(compute_dtype)

    def pad_shift(shift):
        return jnp.pad(shift, (0, cout_p - cout))[:, None].astype(jnp.float32)

    # Static residual routing: groups[o] = input channels added into channel o.
    # (Rebuild params if the 'indices' buffer changes at runtime.)
    idx_host = [int(v) for v in jax.device_get(jnp.asarray(indices))]
    groups = tuple(tuple(c for c, t in enumerate(idx_host) if t == o)
                   for o in range(cout_p))

    return {
        "w1": fold_pad(w1_oihw, s1, cin, cin_p),
        "b1": pad_shift(b1 - m1 * s1),
        "w2": fold_pad(w2_oihw, s2, cout, cout_p),
        "b2": pad_shift(b2 - m2 * s2),
        "groups": groups,
        "cout": cout,
    }


def _choose_batch_block(N, HW, cin_p, cout_p, operand_itemsize,
                        vmem_budget=20 << 20):
    """Largest batch block that fits VMEM while keeping >=2 parallel steps."""
    def step_bytes(b):
        L = b * HW
        return (2 * (cin_p + cout_p) * L * 4            # x / out blocks (dbl-buf)
                + cout_p * L * 4                        # h1 scratch (f32)
                + 9 * max(cin_p, cout_p) * L * operand_itemsize)  # patch scratch
    legal = [b for b in range(1, N + 1)
             if N % b == 0 and ((b * HW) % 128 == 0 or b == N)]
    fitting = [b for b in legal if step_bytes(b) <= vmem_budget] or [min(legal)]
    multi = [b for b in fitting if N // b >= 2]         # v7x: keep both TCs busy
    return max(multi) if multi else max(fitting)


@functools.partial(jax.jit,
                   static_argnames=("groups", "cout", "batch_block", "per_tap"))
def _forward_impl(x, w1, b1, w2, b2, *, groups, cout, batch_block, per_tap):
    N, Cin, H, Wd = x.shape
    HW = H * Wd
    cout_p = w1.shape[0]
    cin_p = w1.shape[1] // 9
    compute_dtype = w1.dtype
    B = batch_block
    assert N % B == 0, "batch_block must divide the batch size"
    L = B * HW
    assert L % 128 == 0 or B == N, (
        "per-step lane width (batch_block * H * W) must be a multiple of 128")

    # channels-major, batch folded into the lane dim: (Cin_p, N*HW).
    x_cm = (x.astype(jnp.float32).reshape(N, Cin, HW)
            .transpose(1, 0, 2).reshape(Cin, N * HW))
    if cin_p > Cin:
        x_cm = jnp.pad(x_cm, ((0, cin_p - Cin), (0, 0)))

    masks = _tap_masks(H, Wd)                            # (9, HW) f32

    if per_tap is None:
        im2col_1, im2col_2 = cin_p < 128, cout_p < 128   # im2col only at small C
    else:
        im2col_1 = im2col_2 = not per_tap

    ob = jnp.dtype(compute_dtype).itemsize
    patch_rows = 9 * max(cin_p if im2col_1 else 0, cout_p if im2col_2 else 0)
    scratch = [pltpu.VMEM((cout_p, L), jnp.float32)]     # h1 staging
    if patch_rows:
        scratch.append(pltpu.VMEM((patch_rows, L), compute_dtype))

    est = (2 * (cin_p + cout_p) * L * 4
           + 2 * (9 * HW * 4 + w1.size * ob + w2.size * ob + 2 * cout_p * 4)
           + cout_p * L * 4 + patch_rows * L * ob)
    vmem_limit = int(min(96 << 20, max(8 << 20, 2 * est)))

    kernel = functools.partial(
        basic_block_kernel, W=Wd, B=B, groups=groups,
        im2col_1=im2col_1, im2col_2=im2col_2, compute_dtype=compute_dtype)

    out_cm = pl.pallas_call(
        kernel,
        out_shape=jax.ShapeDtypeStruct((cout_p, N * HW), jnp.float32),
        grid=(N // B,),
        in_specs=[
            pl.BlockSpec((cin_p, L), lambda nb: (0, nb)),           # x block
            pl.BlockSpec((9, HW), lambda nb: (0, 0)),               # masks
            pl.BlockSpec((cout_p, 9 * cin_p), lambda nb: (0, 0)),   # w1
            pl.BlockSpec((cout_p, 1), lambda nb: (0, 0)),           # b1
            pl.BlockSpec((cout_p, 9 * cout_p), lambda nb: (0, 0)),  # w2
            pl.BlockSpec((cout_p, 1), lambda nb: (0, 0)),           # b2
        ],
        out_specs=pl.BlockSpec((cout_p, L), lambda nb: (0, nb)),
        scratch_shapes=scratch,
        compiler_params=pltpu.CompilerParams(
            dimension_semantics=("parallel",),
            vmem_limit_bytes=vmem_limit),
    )(x_cm, masks, w1, b1, w2, b2)

    out_cm = out_cm[:cout]                               # drop padded channels
    return out_cm.reshape(cout, N, H, Wd).transpose(1, 0, 2, 3)


def basic_block_forward(x_nchw, params, *, batch_block=None, per_tap=None):
    """x_nchw: (N, Cin, H, W) float32 -> (N, Cout, H, W) float32."""
    N, Cin, H, W = x_nchw.shape
    w1 = params["w1"]
    cout_p, cin_p = int(w1.shape[0]), int(w1.shape[1]) // 9
    if batch_block is None:
        batch_block = _choose_batch_block(
            N, H * W, cin_p, cout_p, jnp.dtype(w1.dtype).itemsize)
    return _forward_impl(x_nchw, w1, params["b1"], params["w2"], params["b2"],
                         groups=params["groups"], cout=params["cout"],
                         batch_block=int(batch_block), per_tap=per_tap)


# ----------------------------- reference (pure JAX) -----------------------------

def _ref_forward(x_nchw, w1, bn1, w2, bn2, indices, eps=1e-5):
    def conv(x, w):
        return jax.lax.conv_general_dilated(
            x, w, window_strides=(1, 1), padding=((1, 1), (1, 1)),
            dimension_numbers=("NCHW", "OIHW", "NCHW"))

    def bn(x, g, b, m, v):
        s = g / jnp.sqrt(v + eps)
        return x * s[None, :, None, None] + (b - m * s)[None, :, None, None]

    out = jax.nn.relu(bn(conv(x_nchw, w1), *bn1))
    out = bn(conv(out, w2), *bn2)
    out = out.at[:, indices].add(x_nchw)       # index_add_ along channel dim
    return jax.nn.relu(out)


# ----------------------------- main -----------------------------

if __name__ == "__main__":
    N, Cin, Cout, H, W = 2, 4, 4, 16, 16   # stride=1, downsample=None

    key = jax.random.PRNGKey(0)
    ks = jax.random.split(key, 11)

    # conv weights, PyTorch OIHW layout (no bias, as in conv3x3)
    w1_oihw = jax.random.normal(ks[0], (Cout, Cin, 3, 3), jnp.float32) * 0.2
    w2_oihw = jax.random.normal(ks[1], (Cout, Cout, 3, 3), jnp.float32) * 0.2

    # BatchNorm params + running stats (inference mode)
    g1 = 1.0 + 0.1 * jax.random.normal(ks[2], (Cout,), jnp.float32)
    b1 = 0.1 * jax.random.normal(ks[3], (Cout,), jnp.float32)
    m1 = 0.1 * jax.random.normal(ks[4], (Cout,), jnp.float32)
    v1 = 0.5 + jax.random.uniform(ks[5], (Cout,), jnp.float32)
    g2 = 1.0 + 0.1 * jax.random.normal(ks[6], (Cout,), jnp.float32)
    b2 = 0.1 * jax.random.normal(ks[7], (Cout,), jnp.float32)
    m2 = 0.1 * jax.random.normal(ks[8], (Cout,), jnp.float32)
    v2 = 0.5 + jax.random.uniform(ks[9], (Cout,), jnp.float32)

    # 'indices' buffer: zeros of length = identity channels (as in __init__)
    indices = jnp.zeros((Cin,), dtype=jnp.int32)

    x = jax.random.normal(ks[10], (N, Cin, H, W), jnp.float32)

    ref = _ref_forward(x, w1_oihw, (g1, b1, m1, v1),
                       w2_oihw, (g2, b2, m2, v2), indices)

    # 1) Default (bf16 MXU operands, im2col path, batch-blocked grid).
    params_bf16 = prepare_params(w1_oihw, (g1, b1, m1, v1),
                                 w2_oihw, (g2, b2, m2, v2), indices,
                                 compute_dtype=jnp.bfloat16)
    out_bf16 = jax.block_until_ready(basic_block_forward(x, params_bf16))
    assert out_bf16.shape == (N, Cout, H, W)
    assert jnp.allclose(out_bf16, ref, atol=1e-1, rtol=1e-1), \
        float(jnp.abs(out_bf16 - ref).max())

    # 2) f32 operands: exact-semantics check of the fused kernel (im2col path).
    params_f32 = prepare_params(w1_oihw, (g1, b1, m1, v1),
                                w2_oihw, (g2, b2, m2, v2), indices,
                                compute_dtype=jnp.float32)
    out_f32 = jax.block_until_ready(basic_block_forward(x, params_f32))
    assert jnp.allclose(out_f32, ref, atol=1e-4, rtol=1e-4), \
        float(jnp.abs(out_f32 - ref).max())

    # 3) f32, forced per-tap accumulation path + full batch fold (grid of 1).
    out_pt = jax.block_until_ready(
        basic_block_forward(x, params_f32, per_tap=True, batch_block=N))
    assert jnp.allclose(out_pt, ref, atol=1e-4, rtol=1e-4), \
        float(jnp.abs(out_pt - ref).max())

    print("KERNEL_OK")
</pallas_src>

<mosaic_0001>
module attributes {stable_mosaic.version = 11 : i64} {
  func.func @basic_block_kernel(%arg0: i32, %arg1: memref<8x256xf32, #tpu.memory_space<vmem>>, %arg2: memref<9x256xf32, #tpu.memory_space<vmem>>, %arg3: memref<8x72xbf16, #tpu.memory_space<vmem>>, %arg4: memref<8x1xf32, #tpu.memory_space<vmem>>, %arg5: memref<8x72xbf16, #tpu.memory_space<vmem>>, %arg6: memref<8x1xf32, #tpu.memory_space<vmem>>, %arg7: memref<8x256xf32, #tpu.memory_space<vmem>>, %arg8: memref<8x256xf32, #tpu.memory_space<vmem>>, %arg9: memref<72x256xbf16, #tpu.memory_space<vmem>>) attributes {dimension_semantics = [#tpu.dimension_semantics<parallel>], iteration_bounds = array<i64: 2>, scalar_prefetch = 0 : i64, scratch_operands = 2 : i64, tpu.core_type = #tpu.core_type<tc>, window_params = [{transform_indices = @transform_0, window_bounds = array<i64: 8, 256>}, {pipeline_mode = #tpu.pipeline_mode<synchronous>, transform_indices = @transform_1, window_bounds = array<i64: 9, 256>}, {pipeline_mode = #tpu.pipeline_mode<synchronous>, transform_indices = @transform_2, window_bounds = array<i64: 8, 72>}, {pipeline_mode = #tpu.pipeline_mode<synchronous>, transform_indices = @transform_3, window_bounds = array<i64: 8, 1>}, {pipeline_mode = #tpu.pipeline_mode<synchronous>, transform_indices = @transform_4, window_bounds = array<i64: 8, 72>}, {pipeline_mode = #tpu.pipeline_mode<synchronous>, transform_indices = @transform_5, window_bounds = array<i64: 8, 1>}, {transform_indices = @transform_6, window_bounds = array<i64: 8, 256>}]} {
    %c0 = arith.constant 0 : index
    %c0_0 = arith.constant 0 : index
    %0 = vector.load %arg2[%c0, %c0_0] : memref<9x256xf32, #tpu.memory_space<vmem>>, vector<9x256xf32>
    %c0_1 = arith.constant 0 : index
    %c0_2 = arith.constant 0 : index
    %1 = vector.load %arg1[%c0_1, %c0_2] : memref<8x256xf32, #tpu.memory_space<vmem>>, vector<8x256xf32>
    %c17_i32 = arith.constant 17 : i32
    %2 = tpu.dynamic_rotate %1 by %c17_i32 dim 1 : vector<8x256xf32>, i32 -> vector<8x256xf32>
    %3 = vector.extract_strided_slice %0 {offsets = [0, 0], sizes = [1, 256], strides = [1, 1]} : vector<9x256xf32> to vector<1x256xf32>
    %4 = vector.broadcast %3 : vector<1x256xf32> to vector<8x256xf32>
    %5 = arith.mulf %2, %4 : vector<8x256xf32>
    %6 = arith.truncf %5 : vector<8x256xf32> to vector<8x256xbf16>
    %c0_3 = arith.constant 0 : index
    %c0_4 = arith.constant 0 : index
    %7 = vector.load %arg9[%c0_3, %c0_4] : memref<72x256xbf16, #tpu.memory_space<vmem>>, vector<8x256xbf16>
    tpu.vector_store %arg9[%c0_3, %c0_4], %6 {strides = array<i32>} : memref<72x256xbf16, #tpu.memory_space<vmem>>, vector<8x256xbf16>,
    %c16_i32 = arith.constant 16 : i32
    %8 = tpu.dynamic_rotate %1 by %c16_i32 dim 1 : vector<8x256xf32>, i32 -> vector<8x256xf32>
    %9 = vector.extract_strided_slice %0 {offsets = [1, 0], sizes = [1, 256], strides = [1, 1]} : vector<9x256xf32> to vector<1x256xf32>
    %10 = vector.broadcast %9 : vector<1x256xf32> to vector<8x256xf32>
    %11 = arith.mulf %8, %10 : vector<8x256xf32>
    %12 = arith.truncf %11 : vector<8x256xf32> to vector<8x256xbf16>
    %c8 = arith.constant 8 : index
    %c0_5 = arith.constant 0 : index
    %13 = vector.load %arg9[%c8, %c0_5] : memref<72x256xbf16, #tpu.memory_space<vmem>>, vector<8x256xbf16>
    tpu.vector_store %arg9[%c8, %c0_5], %12 {strides = array<i32>} : memref<72x256xbf16, #tpu.memory_space<vmem>>, vector<8x256xbf16>,
    %c15_i32 = arith.constant 15 : i32
    %14 = tpu.dynamic_rotate %1 by %c15_i32 dim 1 : vector<8x256xf32>, i32 -> vector<8x256xf32>
    %15 = vector.extract_strided_slice %0 {offsets = [2, 0], sizes = [1, 256], strides = [1, 1]} : vector<9x256xf32> to vector<1x256xf32>
    %16 = vector.broadcast %15 : vector<1x256xf32> to vector<8x256xf32>
    %17 = arith.mulf %14, %16 : vector<8x256xf32>
    %18 = arith.truncf %17 : vector<8x256xf32> to vector<8x256xbf16>
    %c16 = arith.constant 16 : index
    %c0_6 = arith.constant 0 : index
    %19 = vector.load %arg9[%c16, %c0_6] : memref<72x256xbf16, #tpu.memory_space<vmem>>, vector<8x256xbf16>
    tpu.vector_store %arg9[%c16, %c0_6], %18 {strides = array<i32>} : memref<72x256xbf16, #tpu.memory_space<vmem>>, vector<8x256xbf16>,
    %c1_i32 = arith.constant 1 : i32
    %20 = tpu.dynamic_rotate %1 by %c1_i32 dim 1 : vector<8x256xf32>, i32 -> vector<8x256xf32>
    %21 = vector.extract_strided_slice %0 {offsets = [3, 0], sizes = [1, 256], strides = [1, 1]} : vector<9x256xf32> to vector<1x256xf32>
    %22 = vector.broadcast %21 : vector<1x256xf32> to vector<8x256xf32>
    %23 = arith.mulf %20, %22 : vector<8x256xf32>
    %24 = arith.truncf %23 : vector<8x256xf32> to vector<8x256xbf16>
    %c24 = arith.constant 24 : index
    %c0_7 = arith.constant 0 : index
    %25 = vector.load %arg9[%c24, %c0_7] : memref<72x256xbf16, #tpu.memory_space<vmem>>, vector<8x256xbf16>
    tpu.vector_store %arg9[%c24, %c0_7], %24 {strides = array<i32>} : memref<72x256xbf16, #tpu.memory_space<vmem>>, vector<8x256xbf16>,
    %26 = arith.truncf %1 : vector<8x256xf32> to vector<8x256xbf16>
    %c32 = arith.constant 32 : index
    %c0_8 = arith.constant 0 : index
    %27 = vector.load %arg9[%c32, %c0_8] : memref<72x256xbf16, #tpu.memory_space<vmem>>, vector<8x256xbf16>
    tpu.vector_store %arg9[%c32, %c0_8], %26 {strides = array<i32>} : memref<72x256xbf16, #tpu.memory_space<vmem>>, vector<8x256xbf16>,
    %c255_i32 = arith.constant 255 : i32
    %28 = tpu.dynamic_rotate %1 by %c255_i32 dim 1 : vector<8x256xf32>, i32 -> vector<8x256xf32>
    %29 = vector.extract_strided_slice %0 {offsets = [5, 0], sizes = [1, 256], strides = [1, 1]} : vector<9x256xf32> to vector<1x256xf32>
    %30 = vector.broadcast %29 : vector<1x256xf32> to vector<8x256xf32>
    %31 = arith.mulf %28, %30 : vector<8x256xf32>
    %32 = arith.truncf %31 : vector<8x256xf32> to vector<8x256xbf16>
    %c40 = arith.constant 40 : index
    %c0_9 = arith.constant 0 : index
    %33 = vector.load %arg9[%c40, %c0_9] : memref<72x256xbf16, #tpu.memory_space<vmem>>, vector<8x256xbf16>
    tpu.vector_store %arg9[%c40, %c0_9], %32 {strides = array<i32>} : memref<72x256xbf16, #tpu.memory_space<vmem>>, vector<8x256xbf16>,
    %c241_i32 = arith.constant 241 : i32
    %34 = tpu.dynamic_rotate %1 by %c241_i32 dim 1 : vector<8x256xf32>, i32 -> vector<8x256xf32>
    %35 = vector.extract_strided_slice %0 {offsets = [6, 0], sizes = [1, 256], strides = [1, 1]} : vector<9x256xf32> to vector<1x256xf32>
    %36 = vector.broadcast %35 : vector<1x256xf32> to vector<8x256xf32>
    %37 = arith.mulf %34, %36 : vector<8x256xf32>
    %38 = arith.truncf %37 : vector<8x256xf32> to vector<8x256xbf16>
    %c48 = arith.constant 48 : index
    %c0_10 = arith.constant 0 : index
    %39 = vector.load %arg9[%c48, %c0_10] : memref<72x256xbf16, #tpu.memory_space<vmem>>, vector<8x256xbf16>
    tpu.vector_store %arg9[%c48, %c0_10], %38 {strides = array<i32>} : memref<72x256xbf16, #tpu.memory_space<vmem>>, vector<8x256xbf16>,
    %c240_i32 = arith.constant 240 : i32
    %40 = tpu.dynamic_rotate %1 by %c240_i32 dim 1 : vector<8x256xf32>, i32 -> vector<8x256xf32>
    %41 = vector.extract_strided_slice %0 {offsets = [7, 0], sizes = [1, 256], strides = [1, 1]} : vector<9x256xf32> to vector<1x256xf32>
    %42 = vector.broadcast %41 : vector<1x256xf32> to vector<8x256xf32>
    %43 = arith.mulf %40, %42 : vector<8x256xf32>
    %44 = arith.truncf %43 : vector<8x256xf32> to vector<8x256xbf16>
    %c56 = arith.constant 56 : index
    %c0_11 = arith.constant 0 : index
    %45 = vector.load %arg9[%c56, %c0_11] : memref<72x256xbf16, #tpu.memory_space<vmem>>, vector<8x256xbf16>
    tpu.vector_store %arg9[%c56, %c0_11], %44 {strides = array<i32>} : memref<72x256xbf16, #tpu.memory_space<vmem>>, vector<8x256xbf16>,
    %c239_i32 = arith.constant 239 : i32
    %46 = tpu.dynamic_rotate %1 by %c239_i32 dim 1 : vector<8x256xf32>, i32 -> vector<8x256xf32>
    %47 = vector.extract_strided_slice %0 {offsets = [8, 0], sizes = [1, 256], strides = [1, 1]} : vector<9x256xf32> to vector<1x256xf32>
    %48 = vector.broadcast %47 : vector<1x256xf32> to vector<8x256xf32>
    %49 = arith.mulf %46, %48 : vector<8x256xf32>
    %50 = arith.truncf %49 : vector<8x256xf32> to vector<8x256xbf16>
    %c64 = arith.constant 64 : index
    %c0_12 = arith.constant 0 : index
    %51 = vector.load %arg9[%c64, %c0_12] : memref<72x256xbf16, #tpu.memory_space<vmem>>, vector<8x256xbf16>
    tpu.vector_store %arg9[%c64, %c0_12], %50 {strides = array<i32>} : memref<72x256xbf16, #tpu.memory_space<vmem>>, vector<8x256xbf16>,
    %c0_13 = arith.constant 0 : index
    %c0_14 = arith.constant 0 : index
    %52 = vector.load %arg3[%c0_13, %c0_14] : memref<8x72xbf16, #tpu.memory_space<vmem>>, vector<8x72xbf16>
    %c0_15 = arith.constant 0 : index
    %c0_16 = arith.constant 0 : index
    %53 = vector.load %arg9[%c0_15, %c0_16] : memref<72x256xbf16, #tpu.memory_space<vmem>>, vector<72x256xbf16>
    %cst = arith.constant dense<0.000000e+00> : vector<8x256xf32>
    %54 = tpu.matmul %52, %53, %cst {dimension_numbers = #tpu.dot_dimension_numbers<[1], [0], [0], [1], [0, 0, 1, 1], [], []>} : vector<8x72xbf16>, vector<72x256xbf16>, vector<8x256xf32> -> vector<8x256xf32>
    %c0_17 = arith.constant 0 : index
    %c0_18 = arith.constant 0 : index
    %55 = vector.load %arg4[%c0_17, %c0_18] : memref<8x1xf32, #tpu.memory_space<vmem>>, vector<8x1xf32>
    %56 = vector.broadcast %55 : vector<8x1xf32> to vector<8x256xf32>
    %57 = arith.addf %54, %56 : vector<8x256xf32>
    %cst_19 = arith.constant 0.000000e+00 : f32
    %58 = vector.broadcast %cst_19 : f32 to vector<8x256xf32>
    %59 = arith.maximumf %57, %58 : vector<8x256xf32>
    %c0_20 = arith.constant 0 : index
    %c0_21 = arith.constant 0 : index
    %60 = vector.load %arg8[%c0_20, %c0_21] : memref<8x256xf32, #tpu.memory_space<vmem>>, vector<8x256xf32>
    tpu.vector_store %arg8[%c0_20, %c0_21], %59 {strides = array<i32>} : memref<8x256xf32, #tpu.memory_space<vmem>>, vector<8x256xf32>,
    %c0_22 = arith.constant 0 : index
    %c0_23 = arith.constant 0 : index
    %61 = vector.load %arg8[%c0_22, %c0_23] : memref<8x256xf32, #tpu.memory_space<vmem>>, vector<8x256xf32>
    %c17_i32_24 = arith.constant 17 : i32
    %62 = tpu.dynamic_rotate %61 by %c17_i32_24 dim 1 : vector<8x256xf32>, i32 -> vector<8x256xf32>
    %63 = vector.extract_strided_slice %0 {offsets = [0, 0], sizes = [1, 256], strides = [1, 1]} : vector<9x256xf32> to vector<1x256xf32>
    %64 = vector.broadcast %63 : vector<1x256xf32> to vector<8x256xf32>
    %65 = arith.mulf %62, %64 : vector<8x256xf32>
    %66 = arith.truncf %65 : vector<8x256xf32> to vector<8x256xbf16>
    %c0_25 = arith.constant 0 : index
    %c0_26 = arith.constant 0 : index
    %67 = vector.load %arg9[%c0_25, %c0_26] : memref<72x256xbf16, #tpu.memory_space<vmem>>, vector<8x256xbf16>
    tpu.vector_store %arg9[%c0_25, %c0_26], %66 {strides = array<i32>} : memref<72x256xbf16, #tpu.memory_space<vmem>>, vector<8x256xbf16>,
    %c16_i32_27 = arith.constant 16 : i32
    %68 = tpu.dynamic_rotate %61 by %c16_i32_27 dim 1 : vector<8x256xf32>, i32 -> vector<8x256xf32>
    %69 = vector.extract_strided_slice %0 {offsets = [1, 0], sizes = [1, 256], strides = [1, 1]} : vector<9x256xf32> to vector<1x256xf32>
    %70 = vector.broadcast %69 : vector<1x256xf32> to vector<8x256xf32>
    %71 = arith.mulf %68, %70 : vector<8x256xf32>
    %72 = arith.truncf %71 : vector<8x256xf32> to vector<8x256xbf16>
    %c8_28 = arith.constant 8 : index
    %c0_29 = arith.constant 0 : index
    %73 = vector.load %arg9[%c8_28, %c0_29] : memref<72x256xbf16, #tpu.memory_space<vmem>>, vector<8x256xbf16>
    tpu.vector_store %arg9[%c8_28, %c0_29], %72 {strides = array<i32>} : memref<72x256xbf16, #tpu.memory_space<vmem>>, vector<8x256xbf16>,
    %c15_i32_30 = arith.constant 15 : i32
    %74 = tpu.dynamic_rotate %61 by %c15_i32_30 dim 1 : vector<8x256xf32>, i32 -> vector<8x256xf32>
    %75 = vector.extract_strided_slice %0 {offsets = [2, 0], sizes = [1, 256], strides = [1, 1]} : vector<9x256xf32> to vector<1x256xf32>
    %76 = vector.broadcast %75 : vector<1x256xf32> to vector<8x256xf32>
    %77 = arith.mulf %74, %76 : vector<8x256xf32>
    %78 = arith.truncf %77 : vector<8x256xf32> to vector<8x256xbf16>
    %c16_31 = arith.constant 16 : index
    %c0_32 = arith.constant 0 : index
    %79 = vector.load %arg9[%c16_31, %c0_32] : memref<72x256xbf16, #tpu.memory_space<vmem>>, vector<8x256xbf16>
    tpu.vector_store %arg9[%c16_31, %c0_32], %78 {strides = array<i32>} : memref<72x256xbf16, #tpu.memory_space<vmem>>, vector<8x256xbf16>,
    %c1_i32_33 = arith.constant 1 : i32
    %80 = tpu.dynamic_rotate %61 by %c1_i32_33 dim 1 : vector<8x256xf32>, i32 -> vector<8x256xf32>
    %81 = vector.extract_strided_slice %0 {offsets = [3, 0], sizes = [1, 256], strides = [1, 1]} : vector<9x256xf32> to vector<1x256xf32>
    %82 = vector.broadcast %81 : vector<1x256xf32> to vector<8x256xf32>
    %83 = arith.mulf %80, %82 : vector<8x256xf32>
    %84 = arith.truncf %83 : vector<8x256xf32> to vector<8x256xbf16>
    %c24_34 = arith.constant 24 : index
    %c0_35 = arith.constant 0 : index
    %85 = vector.load %arg9[%c24_34, %c0_35] : memref<72x256xbf16, #tpu.memory_space<vmem>>, vector<8x256xbf16>
    tpu.vector_store %arg9[%c24_34, %c0_35], %84 {strides = array<i32>} : memref<72x256xbf16, #tpu.memory_space<vmem>>, vector<8x256xbf16>,
    %86 = arith.truncf %61 : vector<8x256xf32> to vector<8x256xbf16>
    %c32_36 = arith.constant 32 : index
    %c0_37 = arith.constant 0 : index
    %87 = vector.load %arg9[%c32_36, %c0_37] : memref<72x256xbf16, #tpu.memory_space<vmem>>, vector<8x256xbf16>
    tpu.vector_store %arg9[%c32_36, %c0_37], %86 {strides = array<i32>} : memref<72x256xbf16, #tpu.memory_space<vmem>>, vector<8x256xbf16>,
    %c255_i32_38 = arith.constant 255 : i32
    %88 = tpu.dynamic_rotate %61 by %c255_i32_38 dim 1 : vector<8x256xf32>, i32 -> vector<8x256xf32>
    %89 = vector.extract_strided_slice %0 {offsets = [5, 0], sizes = [1, 256], strides = [1, 1]} : vector<9x256xf32> to vector<1x256xf32>
    %90 = vector.broadcast %89 : vector<1x256xf32> to vector<8x256xf32>
    %91 = arith.mulf %88, %90 : vector<8x256xf32>
    %92 = arith.truncf %91 : vector<8x256xf32> to vector<8x256xbf16>
    %c40_39 = arith.constant 40 : index
    %c0_40 = arith.constant 0 : index
    %93 = vector.load %arg9[%c40_39, %c0_40] : memref<72x256xbf16, #tpu.memory_space<vmem>>, vector<8x256xbf16>
    tpu.vector_store %arg9[%c40_39, %c0_40], %92 {strides = array<i32>} : memref<72x256xbf16, #tpu.memory_space<vmem>>, vector<8x256xbf16>,
    %c241_i32_41 = arith.constant 241 : i32
    %94 = tpu.dynamic_rotate %61 by %c241_i32_41 dim 1 : vector<8x256xf32>, i32 -> vector<8x256xf32>
    %95 = vector.extract_strided_slice %0 {offsets = [6, 0], sizes = [1, 256], strides = [1, 1]} : vector<9x256xf32> to vector<1x256xf32>
    %96 = vector.broadcast %95 : vector<1x256xf32> to vector<8x256xf32>
    %97 = arith.mulf %94, %96 : vector<8x256xf32>
    %98 = arith.truncf %97 : vector<8x256xf32> to vector<8x256xbf16>
    %c48_42 = arith.constant 48 : index
    %c0_43 = arith.constant 0 : index
    %99 = vector.load %arg9[%c48_42, %c0_43] : memref<72x256xbf16, #tpu.memory_space<vmem>>, vector<8x256xbf16>
    tpu.vector_store %arg9[%c48_42, %c0_43], %98 {strides = array<i32>} : memref<72x256xbf16, #tpu.memory_space<vmem>>, vector<8x256xbf16>,
    %c240_i32_44 = arith.constant 240 : i32
    %100 = tpu.dynamic_rotate %61 by %c240_i32_44 dim 1 : vector<8x256xf32>, i32 -> vector<8x256xf32>
    %101 = vector.extract_strided_slice %0 {offsets = [7, 0], sizes = [1, 256], strides = [1, 1]} : vector<9x256xf32> to vector<1x256xf32>
    %102 = vector.broadcast %101 : vector<1x256xf32> to vector<8x256xf32>
    %103 = arith.mulf %100, %102 : vector<8x256xf32>
    %104 = arith.truncf %103 : vector<8x256xf32> to vector<8x256xbf16>
    %c56_45 = arith.constant 56 : index
    %c0_46 = arith.constant 0 : index
    %105 = vector.load %arg9[%c56_45, %c0_46] : memref<72x256xbf16, #tpu.memory_space<vmem>>, vector<8x256xbf16>
    tpu.vector_store %arg9[%c56_45, %c0_46], %104 {strides = array<i32>} : memref<72x256xbf16, #tpu.memory_space<vmem>>, vector<8x256xbf16>,
    %c239_i32_47 = arith.constant 239 : i32
    %106 = tpu.dynamic_rotate %61 by %c239_i32_47 dim 1 : vector<8x256xf32>, i32 -> vector<8x256xf32>
    %107 = vector.extract_strided_slice %0 {offsets = [8, 0], sizes = [1, 256], strides = [1, 1]} : vector<9x256xf32> to vector<1x256xf32>
    %108 = vector.broadcast %107 : vector<1x256xf32> to vector<8x256xf32>
    %109 = arith.mulf %106, %108 : vector<8x256xf32>
    %110 = arith.truncf %109 : vector<8x256xf32> to vector<8x256xbf16>
    %c64_48 = arith.constant 64 : index
    %c0_49 = arith.constant 0 : index
    %111 = vector.load %arg9[%c64_48, %c0_49] : memref<72x256xbf16, #tpu.memory_space<vmem>>, vector<8x256xbf16>
    tpu.vector_store %arg9[%c64_48, %c0_49], %110 {strides = array<i32>} : memref<72x256xbf16, #tpu.memory_space<vmem>>, vector<8x256xbf16>,
    %c0_50 = arith.constant 0 : index
    %c0_51 = arith.constant 0 : index
    %112 = vector.load %arg5[%c0_50, %c0_51] : memref<8x72xbf16, #tpu.memory_space<vmem>>, vector<8x72xbf16>
    %c0_52 = arith.constant 0 : index
    %c0_53 = arith.constant 0 : index
    %113 = vector.load %arg9[%c0_52, %c0_53] : memref<72x256xbf16, #tpu.memory_space<vmem>>, vector<72x256xbf16>
    %cst_54 = arith.constant dense<0.000000e+00> : vector<8x256xf32>
    %114 = tpu.matmul %112, %113, %cst_54 {dimension_numbers = #tpu.dot_dimension_numbers<[1], [0], [0], [1], [0, 0, 1, 1], [], []>} : vector<8x72xbf16>, vector<72x256xbf16>, vector<8x256xf32> -> vector<8x256xf32>
    %c0_55 = arith.constant 0 : index
    %c0_56 = arith.constant 0 : index
    %115 = vector.load %arg6[%c0_55, %c0_56] : memref<8x1xf32, #tpu.memory_space<vmem>>, vector<8x1xf32>
    %116 = vector.broadcast %115 : vector<8x1xf32> to vector<8x256xf32>
    %117 = arith.addf %114, %116 : vector<8x256xf32>
    %118 = vector.extract_strided_slice %1 {offsets = [0, 0], sizes = [1, 256], strides = [1, 1]} : vector<8x256xf32> to vector<1x256xf32>
    %119 = vector.extract_strided_slice %1 {offsets = [1, 0], sizes = [1, 256], strides = [1, 1]} : vector<8x256xf32> to vector<1x256xf32>
    %120 = arith.addf %118, %119 : vector<1x256xf32>
    %121 = vector.extract_strided_slice %1 {offsets = [2, 0], sizes = [1, 256], strides = [1, 1]} : vector<8x256xf32> to vector<1x256xf32>
    %122 = arith.addf %120, %121 : vector<1x256xf32>
    %123 = vector.extract_strided_slice %1 {offsets = [3, 0], sizes = [1, 256], strides = [1, 1]} : vector<8x256xf32> to vector<1x256xf32>
    %124 = arith.addf %122, %123 : vector<1x256xf32>
    %cst_57 = arith.constant 0.000000e+00 : f32
    %125 = vector.broadcast %cst_57 : f32 to vector<7x256xf32>
    %126 = tpu.concatenate %124, %125 in 0 : vector<1x256xf32>, vector<7x256xf32> -> vector<8x256xf32>
    %127 = arith.addf %117, %126 : vector<8x256xf32>
    %cst_58 = arith.constant 0.000000e+00 : f32
    %128 = vector.broadcast %cst_58 : f32 to vector<8x256xf32>
    %129 = arith.maximumf %127, %128 : vector<8x256xf32>
    %c0_59 = arith.constant 0 : index
    %c0_60 = arith.constant 0 : index
    %130 = vector.load %arg7[%c0_59, %c0_60] : memref<8x256xf32, #tpu.memory_space<vmem>>, vector<8x256xf32>
    tpu.vector_store %arg7[%c0_59, %c0_60], %129 {strides = array<i32>} : memref<8x256xf32, #tpu.memory_space<vmem>>, vector<8x256xf32>,
    return
  }
  func.func @transform_0(%arg0: i32) -> (i32, i32) {
    %c0_i32 = arith.constant 0 : i32
    %c0_i32_0 = arith.constant 0 : i32
    return %c0_i32, %arg0 : i32, i32
  }
  func.func @transform_1(%arg0: i32) -> (i32, i32) {
    %c0_i32 = arith.constant 0 : i32
    %c0_i32_0 = arith.constant 0 : i32
    %c0_i32_1 = arith.constant 0 : i32
    return %c0_i32, %c0_i32_0 : i32, i32
  }
  func.func @transform_2(%arg0: i32) -> (i32, i32) {
    %c0_i32 = arith.constant 0 : i32
    %c0_i32_0 = arith.constant 0 : i32
    %c0_i32_1 = arith.constant 0 : i32
    return %c0_i32, %c0_i32_0 : i32, i32
  }
  func.func @transform_3(%arg0: i32) -> (i32, i32) {
    %c0_i32 = arith.constant 0 : i32
    %c0_i32_0 = arith.constant 0 : i32
    %c0_i32_1 = arith.constant 0 : i32
    return %c0_i32, %c0_i32_0 : i32, i32
  }
  func.func @transform_4(%arg0: i32) -> (i32, i32) {
    %c0_i32 = arith.constant 0 : i32
    %c0_i32_0 = arith.constant 0 : i32
    %c0_i32_1 = arith.constant 0 : i32
    return %c0_i32, %c0_i32_0 : i32, i32
  }
  func.func @transform_5(%arg0: i32) -> (i32, i32) {
    %c0_i32 = arith.constant 0 : i32
    %c0_i32_0 = arith.constant 0 : i32
    %c0_i32_1 = arith.constant 0 : i32
    return %c0_i32, %c0_i32_0 : i32, i32
  }
  func.func @transform_6(%arg0: i32) -> (i32, i32) {
    %c0_i32 = arith.constant 0 : i32
    %c0_i32_0 = arith.constant 0 : i32
    return %c0_i32, %arg0 : i32, i32
  }
}

</mosaic_0001>

<bundles_post_ra>
// kernel: _forward_impl.1
= control target key start
LH: loop header
LB: loop body
LE: loop exit
PB: predicated region body
PF: predicated region fallthrough
CT: control target
= control target key end

     0   :  { %s1104_s21 = smov 0   ;;  %s1396_s0 = inlined_call_operand.vmem [shape: f32[8,512], index: 0, kind: input, shape index: {}]   ;;  %s1397_s1 = inlined_call_operand.vmem [shape: f32[9,256], index: 1, kind: input, shape index: {}]   ;;  %s1398_s2 = inlined_call_operand.vmem [shape: bf16[8,72], index: 2, kind: input, shape index: {}]   ;;  %s1399_s3 = inlined_call_operand.vmem [shape: f32[8,1], index: 3, kind: input, shape index: {}]   ;;  %s1400_s4 = inlined_call_operand.vmem [shape: bf16[8,72], index: 4, kind: input, shape index: {}]   ;;  %s1401_s5 = inlined_call_operand.vmem [shape: f32[8,1], index: 5, kind: input, shape index: {}]   ;;  %s1402_s6 = inlined_call_operand.vmem [shape: f32[8,512], index: 6, kind: output, shape index: {}]  }
   0x1 LB: > { %s941_s22 = sadd.s32 4294967295, %s1058_s21   ;;  %p945_p0 = scmp.ge.s32.totalorder %s1058_s21, 1  ;;  %s1058_s21 = sphi %s1104_s21, %s16_s21  }
   0x2   : > { %p213_p1 = scmp.lt.s32.totalorder %s1058_s21, 3 }
   0x4   : > { %p214_p2 = pnand %p945_p0, %p213_p1 }
   0x5   : > { %s946_s23 = sshll.u32 (!%p214_p2), %s941_s22, 1  ;;  %s1060_s28 = smov (!%p214_p2), 16   ;;  %v1066_v2 = vmov (!%p214_p2), 0   ;;  %v491_v3 = vld [vmem:[%s1399_s3] sm:$0xff] (!%p214_p2)  ;;  %v266_v4 = vlaneseq (!%p214_p2)  ;;  %v1173_v10 = vld [vmem:[%s1397_s1 + $0x8] sm:$0xff] (!%p214_p2)  ;;  %vm546_vm8 = vcmask (!%p214_p2), 1043456  }
   0x6   : > { %217 = sbr.rel (%p214_p2) target bundleno = 761 (0x2f9), region = 44  ;;  %p244_p3 = scmp.lt.s32.totalorder (!%p214_p2), %s946_s23, 3  ;;  %585 = vmatprep.mubr.bf16.mxu0 (!%p214_p2), %v1066_v2  ;;  %1051 = vset.pattern.permute.xlu0 (!%p214_p2), %v1066_v2  ;;  %v1168_v9 = vld [vmem:[%s1397_s1] sm:$0xff] (!%p214_p2)  ;;  %vm542_vm9 = vcmask (!%p214_p2), 588800   ;;  %vm876_vm10 = vcmask (!%p214_p2), 1040384  }
   0x7   : > { %s1061_s29 = smov (!%p214_p2), 17   ;;  %s1062_s30 = smov (!%p214_p2), 15   ;;  %847 = vmatprep.mubr.bf16.mxu1 (!%p214_p2), %v1066_v2  ;;  %v1159_v5 = vshrl.u32 (!%p214_p2), %v266_v4, 7  ;;  %v1161_v6 = vand.u32 (!%p214_p2), 127, %v266_v4 }
   0x8   : > { %s1063_s7 = smov (!%p214_p2), 1   ;;  %s1064_s8 = smov (!%p214_p2), 127  }
   0x9   : > { %s1065_s9 = smov (!%p214_p2), 113   ;;  %s1067_s10 = smov (!%p214_p2), 112   ;;  %v299_v7 = vsub.s32 (!%p214_p2), 1, %v1159_v5  ;;  %v273_v8 = vsub.s32 (!%p214_p2), 0, %v1159_v5  ;;  %vm294_vm0 = vcmp.lt.s32.totalorder (!%p214_p2), %v1161_v6, 16  ;;  %vm268_vm1 = vcmp.lt.s32.totalorder (!%p214_p2), %v1161_v6, 17 }
   0xa   : > { %s1068_s11 = smov (!%p214_p2), 111   ;;  %v325_v19 = vsub.s32 (!%p214_p2), 2, %v1159_v5  ;;  %v351_v20 = vsub.s32 (!%p214_p2), 3, %v1159_v5  ;;  %vm320_vm2 = vcmp.lt.s32.totalorder (!%p214_p2), %v1161_v6, 15  ;;  %v386_v34 = vsub.s32 (!%p214_p2), 5, %v1159_v5 }
   0xb   : > { %v1178_v13 = vrot.slane (!%p214_p2), %v1168_v9, %v299_v7  ;;  %v1181_v14 = vrot.slane (!%p214_p2), %v1168_v9, %v273_v8  ;;  %v1184_v15 = vrot.slane (!%p214_p2), %v1173_v10, %v273_v8  ;;  %v1187_v16 = vrot.slane (!%p214_p2), %v1173_v10, %v299_v7 }
   0xc   : > { %v1205_v33 = vrot.slane (!%p214_p2), %v1168_v9, %v325_v19  ;;  %v1209_v35 = vrot.slane (!%p214_p2), %v1173_v10, %v325_v19  ;;  %vm346_vm3 = vcmp.lt.s32.totalorder (!%p214_p2), %v1161_v6, 1  ;;  %v1213_v36 = vrot.slane (!%p214_p2), %v1168_v9, %v351_v20 }
   0xd   : > { %s1404_s23 = smov (!%p244_p3, %s946_s23), 3  ;;  %v1216_v37 = vrot.slane %v1173_v10, %v351_v20  ;;  %vm381_vm4 = vcmp.lt.s32.totalorder %v1161_v6, 127  ;;  %v1228_v44 = vrot.slane %v1168_v9, %v386_v34  ;;  %v1231_v45 = vrot.slane %v1173_v10, %v386_v34 }
   0xe   : > { %s947_s24 = sshll.u32 %s1404_s23, 3  ;;  %v412_v56 = vsub.s32 6, %v1159_v5  ;;  %v438_v59 = vsub.s32 7, %v1159_v5  ;;  %vm407_vm5 = vcmp.lt.s32.totalorder %v1161_v6, 113  ;;  %vm433_vm6 = vcmp.lt.s32.totalorder %v1161_v6, 112 }
   0xf   : > { %s247_s27 = scalar_lea.vmem %s1396_s0, %s947_s24  ;;  %vm459_vm7 = vcmp.lt.s32.totalorder %v1161_v6, 111 }
  0x10   : > { %v1120_v0 = vld [vmem:[%s247_s27] sm:$0xff]  ;;  %v1126_v1 = vld [vmem:[%s247_s27 + $0x8] sm:$0xff]  ;;  %v1249_v2 = vrot.slane %v1168_v9, %v412_v56  ;;  %v1256_v4 = vrot.slane %v1168_v9, %v438_v59  ;;  %v1259_v5 = vrot.slane %v1173_v10, %v438_v59 }
  0x11   : > { %290 = vrot.lane.b32.xlu1 %v1120_v0, %s1060_s28  ;;  %262 = vrot.lane.b32.xlu0 %v1120_v0, %s1061_s29  ;;  %v858_v6 = vrot.slane %v1120_v0, 1 }
  0x15   : > { %292 = vrot.lane.b32.xlu1 %v1126_v1, %s1060_s28  ;;  %264 = vrot.lane.b32.xlu0 %v1126_v1, %s1061_s29 }
  0x19   : > { %318 = vrot.lane.b32.xlu1 %v1126_v1, %s1062_s30  ;;  %316 = vrot.lane.b32.xlu0 %v1120_v0, %s1062_s30 }
  0x1d   : > { %344 = vrot.lane.b32.xlu1 %v1126_v1, %s1063_s7  ;;  %342 = vrot.lane.b32.xlu0 %v1120_v0, %s1063_s7 }
  0x21   : > { %379 = vrot.lane.b32.xlu1 %v1126_v1, %s1064_s8  ;;  %377 = vrot.lane.b32.xlu0 %v1120_v0, %s1064_s8 }
  0x25   : > { %405 = vrot.lane.b32.xlu1 %v1126_v1, %s1065_s9  ;;  %403 = vrot.lane.b32.xlu0 %v1120_v0, %s1065_s9 }
  0x29   : > { %431 = vrot.lane.b32.xlu1 %v1126_v1, %s1067_s10  ;;  %429 = vrot.lane.b32.xlu0 %v1120_v0, %s1067_s10 }
  0x2d   : > { %457 = vrot.lane.b32.xlu1 %v1126_v1, %s1068_s11  ;;  %455 = vrot.lane.b32.xlu0 %v1120_v0, %s1068_s11 }
  0x31   : > { %494 = vperm.xlu0 %1051, %v491_v3   ;;  %v1252_v3 = vrot.slane %v1173_v10, %v412_v56 }
  0x83   : > { %v291_v11 = vpop.permute.xlu1 %290  ;;  %v263_v12 = vpop.permute.xlu0 %262 }
  0x87   : > { %v293_v17 = vpop.permute.xlu1 %292  ;;  %v265_v18 = vpop.permute.xlu0 %264 }
  0x88   : > { %v295_v21 = vsel %vm294_vm0, %v291_v11, %v293_v17  ;;  %v296_v22 = vsel %vm294_vm0, %v293_v17, %v291_v11  ;;  %v269_v23 = vsel %vm268_vm1, %v263_v12, %v265_v18  ;;  %v270_v24 = vsel %vm268_vm1, %v265_v18, %v263_v12 }
  0x89   : > { %v305_v25 = vmul.f32 %v1178_v13, %v296_v22  ;;  %v279_v26 = vmul.f32 %v1181_v14, %v270_v24  ;;  %v280_v27 = vmul.f32 %v1184_v15, %v269_v23  ;;  %v306_v28 = vmul.f32 %v1187_v16, %v295_v21  ;;  %v1277_v21 = vld [vmem:[%s1397_s1 + $0x10] ss:$0 sm:$0xff]  ;;  %v1282_v22 = vld [vmem:[%s1397_s1 + $0x18] ss:$0 sm:$0xff] }
  0x8b   : > { %v319_v29 = vpop.permute.xlu1 %318  ;;  %v317_v30 = vpop.permute.xlu0 %316  ;;  %v1015_v31 = vpack.c.bf16 %v306_v28, %v280_v27  ;;  %v1014_v32 = vpack.c.bf16 %v305_v25, %v279_v26 }
  0x8c   : > { %v321_v38 = vsel %vm320_vm2, %v317_v30, %v319_v29  ;;  %v322_v39 = vsel %vm320_vm2, %v319_v29, %v317_v30 }
  0x8d   : > { %553 = vmatprep.subr.bf16.mxu0 %v1015_v31  ;;  %v331_v46 = vmul.f32 %v1205_v33, %v322_v39  ;;  %v332_v47 = vmul.f32 %v1209_v35, %v321_v38  ;;  %v481_v38 = vld [vmem:[%s1398_s2] sm:$0xf] }
  0x8e   : > { %554 = vmatpush1.bf16.msra.mxu0 %v1014_v32 }
  0x8f   : > { %v345_v40 = vpop.permute.xlu1 %344  ;;  %v343_v41 = vpop.permute.xlu0 %342 }
  0x90   : > { %v347_v42 = vsel %vm346_vm3, %v343_v41, %v345_v40  ;;  %v348_v43 = vsel %vm346_vm3, %v345_v40, %v343_v41 }
  0x91   : > { %v357_v48 = vmul.f32 %v1213_v36, %v348_v43  ;;  %v358_v49 = vmul.f32 %v1216_v37, %v347_v42 }
  0x93   : > { %v380_v50 = vpop.permute.xlu1 %379  ;;  %v378_v51 = vpop.permute.xlu0 %377  ;;  %v1017_v52 = vpack.c.bf16 %v358_v49, %v332_v47  ;;  %v1016_v53 = vpack.c.bf16 %v357_v48, %v331_v46 }
  0x94   : > { %v382_v54 = vsel %vm381_vm4, %v378_v51, %v380_v50  ;;  %v383_v55 = vsel %vm381_vm4, %v380_v50, %v378_v51  ;;  %v755_v50 = vld [vmem:[%s1401_s5] sm:$0xff] }
  0x95   : > { %v392_v57 = vmul.f32 %v1228_v44, %v382_v54  ;;  %v393_v58 = vmul.f32 %v1231_v45, %v383_v55  ;;  %555 = vmatprep.subr.bf16.mxu0 %v1017_v52 }
  0x96   : > { %556 = vmatpush1.bf16.msra.mxu0 %v1016_v53 }
  0x97   : > { %v406_v60 = vpop.permute.xlu1 %405  ;;  %v404_v61 = vpop.permute.xlu0 %403  ;;  %v1019_v62 = vpack.c.bf16 %v393_v58, %v1126_v1  ;;  %v1018_v63 = vpack.c.bf16 %v392_v57, %v1120_v0 }
  0x98   : > { %v408_v7 = vsel %vm407_vm5, %v404_v61, %v406_v60  ;;  %v409_v8 = vsel %vm407_vm5, %v406_v60, %v404_v61 }
  0x99   : > { %557 = vmatprep.subr.bf16.mxu0 %v1019_v62  ;;  %v418_v9 = vmul.f32 %v1249_v2, %v408_v7  ;;  %v419_v10 = vmul.f32 %v1252_v3, %v409_v8 }
  0x9a   : > { %558 = vmatpush1.bf16.msra.mxu0 %v1018_v63 }
  0x9b   : > { %v432_v11 = vpop.permute.xlu1 %431  ;;  %v430_v12 = vpop.permute.xlu0 %429 }
  0x9c   : > { %v434_v17 = vsel %vm433_vm6, %v430_v12, %v432_v11  ;;  %v435_v18 = vsel %vm433_vm6, %v432_v11, %v430_v12 }
  0x9d   : > { %v444_v19 = vmul.f32 %v1256_v4, %v434_v17  ;;  %v445_v20 = vmul.f32 %v1259_v5, %v435_v18 }
  0x9f   : > { %v458_v23 = vpop.permute.xlu1 %457  ;;  %v456_v24 = vpop.permute.xlu0 %455  ;;  %v1021_v25 = vpack.c.bf16 %v445_v20, %v419_v10  ;;  %v1020_v26 = vpack.c.bf16 %v444_v19, %v418_v9 }
  0xa0   : > { %v460_v27 = vsel %vm459_vm7, %v456_v24, %v458_v23  ;;  %v461_v28 = vsel %vm459_vm7, %v458_v23, %v456_v24 }
  0xa1   : > { %v470_v29 = vmul.f32 %v1277_v21, %v460_v27  ;;  %v471_v30 = vmul.f32 %v1282_v22, %v461_v28  ;;  %559 = vmatprep.subr.bf16.mxu0 %v1021_v25 }
  0xa2   : > { %560 = vmatpush1.bf16.msra.mxu0 %v1020_v26 }
  0xa3   : > { %v1022_v31 = vpack.c.bf16 %v470_v29, %v470_v29  ;;  %v1023_v32 = vpack.c.bf16 %v471_v30, %v471_v30 }
  0xa5   : > { %971 = vmatprep.subr.msk.bf16.mxu0 %vm546_vm8, %v1023_v32  ;;  %v548_v34 = vsel %vm546_vm8, %v1022_v31, 0 }
  0xa6   : > { %562 = vmatpush1.bf16.msra.mxu0 %v548_v34 }
  0xa9   : > { %972 = vmatmul.mubr.msk.bf16.vlgmr.msra.gmra.mrb[0].mxu0 %vm542_vm9, %v481_v38 }
  0xb0   : > { %v495_v39 = vpop.permute.xlu0 %494 }
 0x17c   : > { %v587_v40 = vpop.f32.mrb[0].mxu0 }
 0x17d   : > { %v588_v41 = vadd.f32 %v587_v40, %v495_v39  ;;  %v589_v42 = vpop.f32.mrb[1].mxu0 }
 0x17e   : > { %v591_v43 = vpop.f32.mrb[2].mxu0  ;;  %v590_v47 = vadd.f32 %v589_v42, %v495_v39 }
 0x17f   : > { %v1296_v46 = vmax.f32 %v588_v41, 0.0  ;;  %v592_v48 = vpop.f32.mrb[3].mxu0 }
 0x180   : > { %v595_v49 = vmax.f32 %v590_v47, 0.0 }
 0x181   : > { %617 = vrot.lane.b32.xlu0 %v1296_v46, %s1060_s28  ;;  %600 = vrot.lane.b32.xlu1 %v1296_v46, %s1061_s29 }
 0x185   : > { %634 = vrot.lane.b32.xlu0 %v1296_v46, %s1062_s30  ;;  %602 = vrot.lane.b32.xlu1 %v595_v49, %s1061_s29 }
 0x189   : > { %651 = vrot.lane.b32.xlu0 %v1296_v46, %s1063_s7  ;;  %619 = vrot.lane.b32.xlu1 %v595_v49, %s1060_s28 }
 0x18d   : > { %677 = vrot.lane.b32.xlu0 %v1296_v46, %s1064_s8  ;;  %636 = vrot.lane.b32.xlu1 %v595_v49, %s1062_s30 }
 0x191   : > { %694 = vrot.lane.b32.xlu0 %v1296_v46, %s1065_s9  ;;  %653 = vrot.lane.b32.xlu1 %v595_v49, %s1063_s7 }
 0x195   : > { %711 = vrot.lane.b32.xlu0 %v1296_v46, %s1067_s10  ;;  %679 = vrot.lane.b32.xlu1 %v595_v49, %s1064_s8 }
 0x199   : > { %728 = vrot.lane.b32.xlu0 %v1296_v46, %s1068_s11  ;;  %696 = vrot.lane.b32.xlu1 %v595_v49, %s1065_s9  ;;  %s253_s9 = scalar_lea.vmem %s1402_s6, %s947_s24 }
 0x19d   : > { %758 = vperm.xlu0 %1051, %v755_v50   ;;  %713 = vrot.lane.b32.xlu1 %v595_v49, %s1067_s10 }
 0x1a1   : > { %730 = vrot.lane.b32.xlu1 %v595_v49, %s1068_s11 }
 0x1f3   : > { %v618_v51 = vpop.permute.xlu0 %617  ;;  %v601_v52 = vpop.permute.xlu1 %600 }
 0x1f7   : > { %v635_v53 = vpop.permute.xlu0 %634  ;;  %v603_v54 = vpop.permute.xlu1 %602 }
 0x1f8   : > { %v604_v55 = vsel %vm268_vm1, %v601_v52, %v603_v54  ;;  %v605_v56 = vsel %vm268_vm1, %v603_v54, %v601_v52  ;;  %v864_v52 = vrot.slane %v1120_v0, 2  ;;  %v865_v54 = vrot.slane %v1126_v1, 2 }
 0x1f9   : > { %v606_v61 = vmul.f32 %v605_v56, %v1181_v14  ;;  %v607_v63 = vmul.f32 %v604_v55, %v1184_v15  ;;  %v870_v56 = vrot.slane %v1120_v0, 3 }
 0x1fb   : > { %v652_v57 = vpop.permute.xlu0 %651  ;;  %v620_v58 = vpop.permute.xlu1 %619 }
 0x1fc   : > { %v621_v59 = vsel %vm294_vm0, %v618_v51, %v620_v58  ;;  %v622_v60 = vsel %vm294_vm0, %v620_v58, %v618_v51  ;;  %v745_v51 = vld [vmem:[%s1400_s4] sm:$0xf]  ;;  %v871_v58 = vrot.slane %v1126_v1, 3 }
 0x1fd   : > { %v623_v62 = vmul.f32 %v622_v60, %v1178_v13  ;;  %v624_v7 = vmul.f32 %v621_v59, %v1187_v16 }
 0x1ff   : > { %v637_v8 = vpop.permute.xlu1 %636  ;;  %v1025_v11 = vpack.c.bf16 %v624_v7, %v607_v63  ;;  %v1024_v12 = vpack.c.bf16 %v623_v62, %v606_v61  ;;  %v678_v17 = vpop.permute.xlu0 %677 }
 0x200   : > { %v638_v18 = vsel %vm320_vm2, %v635_v53, %v637_v8  ;;  %v639_v9 = vsel %vm320_vm2, %v637_v8, %v635_v53 }
 0x201   : > { %815 = vmatprep.subr.bf16.mxu1 %v1025_v11  ;;  %v640_v15 = vmul.f32 %v639_v9, %v1205_v33  ;;  %v641_v16 = vmul.f32 %v638_v18, %v1209_v35 }
 0x202   : > { %816 = vmatpush1.bf16.msra.mxu1 %v1024_v12 }
 0x203   : > { %v654_v10 = vpop.permute.xlu1 %653  ;;  %v695_v23 = vpop.permute.xlu0 %694 }
 0x204   : > { %v655_v13 = vsel %vm346_vm3, %v652_v57, %v654_v10  ;;  %v656_v14 = vsel %vm346_vm3, %v654_v10, %v652_v57 }
 0x205   : > { %v657_v19 = vmul.f32 %v656_v14, %v1213_v36  ;;  %v658_v20 = vmul.f32 %v655_v13, %v1216_v37 }
 0x207   : > { %v680_v24 = vpop.permute.xlu1 %679  ;;  %v1027_v25 = vpack.c.bf16 %v658_v20, %v641_v16  ;;  %v1026_v26 = vpack.c.bf16 %v657_v19, %v640_v15  ;;  %v712_v30 = vpop.permute.xlu0 %711 }
 0x208   : > { %v681_v27 = vsel %vm381_vm4, %v678_v17, %v680_v24  ;;  %v682_v28 = vsel %vm381_vm4, %v680_v24, %v678_v17 }
 0x209   : > { %v683_v29 = vmul.f32 %v681_v27, %v1228_v44  ;;  %v684_v33 = vmul.f32 %v682_v28, %v1231_v45  ;;  %817 = vmatprep.subr.bf16.mxu1 %v1027_v25 }
 0x20a   : > { %818 = vmatpush1.bf16.msra.mxu1 %v1026_v26 }
 0x20b   : > { %v697_v35 = vpop.permute.xlu1 %696  ;;  %v1029_v36 = vpack.c.bf16 %v684_v33, %v595_v49  ;;  %v1028_v37 = vpack.c.bf16 %v683_v29, %v1296_v46  ;;  %v729_v42 = vpop.permute.xlu0 %728 }
 0x20c   : > { %v698_v31 = vsel %vm407_vm5, %v695_v23, %v697_v35  ;;  %v699_v32 = vsel %vm407_vm5, %v697_v35, %v695_v23 }
 0x20d   : > { %819 = vmatprep.subr.bf16.mxu1 %v1029_v36  ;;  %v700_v38 = vmul.f32 %v698_v31, %v1249_v2  ;;  %v701_v39 = vmul.f32 %v699_v32, %v1252_v3 }
 0x20e   : > { %820 = vmatpush1.bf16.msra.mxu1 %v1028_v37 }
 0x20f   : > { %v714_v34 = vpop.permute.xlu1 %713 }
 0x210   : > { %v715_v44 = vsel %vm433_vm6, %v712_v30, %v714_v34  ;;  %v716_v45 = vsel %vm433_vm6, %v714_v34, %v712_v30 }
 0x211   : > { %v717_v40 = vmul.f32 %v715_v44, %v1256_v4  ;;  %v718_v41 = vmul.f32 %v716_v45, %v1259_v5 }
 0x213   : > { %v731_v43 = vpop.permute.xlu1 %730  ;;  %v1031_v46 = vpack.c.bf16 %v718_v41, %v701_v39  ;;  %v1030_v47 = vpack.c.bf16 %v717_v40, %v700_v38 }
 0x214   : > { %v732_v48 = vsel %vm459_vm7, %v729_v42, %v731_v43  ;;  %v733_v49 = vsel %vm459_vm7, %v731_v43, %v729_v42 }
 0x215   : > { %v734_v50 = vmul.f32 %v1277_v21, %v732_v48  ;;  %v735_v2 = vmul.f32 %v1282_v22, %v733_v49  ;;  %821 = vmatprep.subr.bf16.mxu1 %v1031_v46  ;;  %v859_v21 = vrot.slane %v1126_v1, 1  ;;  %v862_v22 = vadd.f32 %v858_v6, %v1120_v0 }
 0x216   : > { %822 = vmatpush1.bf16.msra.mxu1 %v1030_v47 }
 0x217   : > { %v1032_v3 = vpack.c.bf16 %v734_v50, %v734_v50  ;;  %v1033_v4 = vpack.c.bf16 %v735_v2, %v735_v2  ;;  %v863_v53 = vadd.f32 %v859_v21, %v1126_v1  ;;  %v868_v55 = vadd.f32 %v864_v52, %v862_v22 }
 0x219   : > { %992 = vmatprep.subr.msk.bf16.mxu1 %vm546_vm8, %v1033_v4  ;;  %v810_v5 = vsel %vm546_vm8, %v1032_v3, 0  ;;  %v869_v57 = vadd.f32 %v865_v54, %v863_v53  ;;  %v874_v59 = vadd.f32 %v870_v56, %v868_v55 }
 0x21a   : > { %824 = vmatpush1.bf16.msra.mxu1 %v810_v5 }
 0x21b   : > { %v875_v60 = vadd.f32 %v871_v58, %v869_v57  ;;  %v877_v63 = vsel %vm876_vm10, %v874_v59, 0.0 }
 0x21c   : > { %v759_v61 = vpop.permute.xlu0 %758 }
 0x21d   : > { %993 = vmatmul.mubr.msk.bf16.vlgmr.msra.gmra.mrb[0].mxu1 %vm542_vm9, %v745_v51  ;;  %v878_v11 = vsel %vm876_vm10, %v875_v60, 0.0 }
 0x2f0   : > { %v849_v62 = vpop.f32.mrb[0].mxu1 }
 0x2f1   : > { %v850_v7 = vadd.f32 %v849_v62, %v759_v61  ;;  %v851_v8 = vpop.f32.mrb[1].mxu1 }
 0x2f2   : > { %v852_v12 = vadd.f32 %v851_v8, %v759_v61  ;;  %v853_v17 = vpop.f32.mrb[2].mxu1 }
 0x2f3   : > { %v879_v18 = vadd.f32 %v877_v63, %v850_v7  ;;  %v854_v9 = vpop.f32.mrb[3].mxu1 }
 0x2f4   : > { %v880_v0 = vadd.f32 %v878_v11, %v852_v12 }
 0x2f5   : > { %v881_v1 = vmax.f32 %v879_v18, 0.0 }
 0x2f6   : > { %v882_v10 = vmax.f32 %v880_v0, 0.0 }
 0x2f7   : > { %883 = vst [vmem:[%s253_s9] sm:$0xff] %v881_v1 }
 0x2f8   : > { %884 = vst [vmem:[%s253_s9 + $0x8] sm:$0xff] %v882_v10 }
 0x2f9 PF: > { %s16_s21 = sadd.s32 1, %s1058_s21  }
 0x2fa   : > { %p13_p4 = scmp.ge.s32.totalorder %s16_s21, 4  }
 0x2fc   :  { %15 = sbr.rel (!%p13_p4) target bundleno = 1 (0x1), region = 74 }

</bundles_post_ra>
